<compile_context>
chip_gen: v7x
topology: tpu7x:2x2x1
jax: 0.10.0
libtpu: 0.0.40
codegen_flags: <defaults>
</compile_context>

<pallas_src>
import functools

import jax
import jax.numpy as jnp
from jax.experimental import pallas as pl
from jax.experimental.pallas import tpu as pltpu

_HEAD_PAD = 128  # fused head width: [adv_0..adv_{ac-1}, value, 0...] -> one lane group


def _round_up(n, m):
    return ((n + m - 1) // m) * m


def dueling_kernel(x_ref, w1_ref, b1_ref, w2_ref, b2_ref, wh_ref, bh_ref,
                   q_ref, *, ac):
    x = x_ref[...]                                                         # (TB, obs)

    # model: Linear(obs,128) -> ReLU -> Linear(128,128) -> ReLU
    # (matmuls may be bf16 operands; accumulation + epilogue are f32)
    h1 = jnp.dot(x, w1_ref[...], preferred_element_type=jnp.float32) + b1_ref[...]
    h1 = jnp.maximum(h1, 0.0)
    h2 = jnp.dot(h1.astype(w2_ref.dtype), w2_ref[...],
                 preferred_element_type=jnp.float32) + b2_ref[...]
    h2 = jnp.maximum(h2, 0.0)

    # fused heads: lanes [0, ac) = advantage, lane ac = value, rest zero-padded
    head = jnp.dot(h2.astype(wh_ref.dtype), wh_ref[...],
                   preferred_element_type=jnp.float32) + bh_ref[...]       # (TB, 128)

    lane = jax.lax.broadcasted_iota(jnp.int32, head.shape, 1)
    # mean over the TRUE ac advantage lanes only (padding excluded).
    adv_mean = jnp.sum(jnp.where(lane < ac, head, 0.0),
                       axis=1, keepdims=True) * (1.0 / ac)                 # (TB, 1)
    value = jnp.sum(jnp.where(lane == ac, head, 0.0),
                    axis=1, keepdims=True)                                 # (TB, 1)

    # q = value + adv - mean(adv); lanes >= ac hold junk and are sliced off
    # in the wrapper (lane-dense store is the point).
    q_ref[...] = value + head - adv_mean


def dueling_forward(x, params, *, block_b=256, param_dtype=jnp.float32):
    """Forward pass.  param_dtype=jnp.bfloat16 casts matmul operands only."""
    (w1, b1, w2, b2, wv, bv, wa, ba) = params
    B, obs = x.shape
    hidden = w1.shape[1]
    ac = wa.shape[1]
    assert ac + 1 <= _HEAD_PAD, "advantage dim must fit one lane group with value"

    # --- fuse the two heads into one lane-dense (hidden, 128) weight/bias ---
    wh = jnp.zeros((hidden, _HEAD_PAD), jnp.float32)
    wh = wh.at[:, :ac].set(wa).at[:, ac].set(wv[:, 0])
    bh = jnp.zeros((1, _HEAD_PAD), jnp.float32)
    bh = bh.at[:, :ac].set(ba).at[:, ac].set(bv[:, 0])

    # matmul operand dtypes (biases stay f32; added after f32 accumulation)
    xc = x.astype(param_dtype)
    w1c = w1.astype(param_dtype)
    w2c = w2.astype(param_dtype)
    whc = wh.astype(param_dtype)

    # --- batch tiling: pad rows to a sublane multiple, stream x/q, keep weights resident ---
    Bp = _round_up(B, 8)
    if Bp != B:
        xc = jnp.pad(xc, ((0, Bp - B), (0, 0)))
    tb = min(block_b, Bp)
    grid = (pl.cdiv(Bp, tb),)

    flops = 2 * B * (obs * hidden + hidden * hidden + hidden * _HEAD_PAD)
    bytes_accessed = int(
        xc.size * xc.dtype.itemsize
        + sum(int(w.size) * w.dtype.itemsize for w in (w1c, w2c, whc))
        + (b1.size + b2.size + bh.size) * 4
        + Bp * _HEAD_PAD * 4
    )

    kernel = functools.partial(dueling_kernel, ac=ac)

    q_pad = pl.pallas_call(
        kernel,
        out_shape=jax.ShapeDtypeStruct((Bp, _HEAD_PAD), jnp.float32),
        grid=grid,
        in_specs=[
            pl.BlockSpec((tb, obs), lambda i: (i, 0)),          # x: streamed per batch tile
            pl.BlockSpec((obs, hidden), lambda i: (0, 0)),      # W1: resident
            pl.BlockSpec((1, hidden), lambda i: (0, 0)),        # b1: resident
            pl.BlockSpec((hidden, hidden), lambda i: (0, 0)),   # W2: resident
            pl.BlockSpec((1, hidden), lambda i: (0, 0)),        # b2: resident
            pl.BlockSpec((hidden, _HEAD_PAD), lambda i: (0, 0)),# fused head W: resident
            pl.BlockSpec((1, _HEAD_PAD), lambda i: (0, 0)),     # fused head b: resident
        ],
        out_specs=pl.BlockSpec((tb, _HEAD_PAD), lambda i: (i, 0)),
        compiler_params=pltpu.CompilerParams(
            dimension_semantics=("parallel",)),                 # megacore on v7x
        cost_estimate=pl.CostEstimate(
            flops=flops, transcendentals=0, bytes_accessed=bytes_accessed),
    )(xc, w1c, b1, w2c, b2, whc, bh)

    return q_pad[:B, :ac]


def init_params(key, obs, ac, hidden=128):
    """Deterministic synthetic init (uniform ~ PyTorch default fan-in scaling)."""
    ks = jax.random.split(key, 8)

    def lin(kw, kb, fan_in, fan_out):
        bound = 1.0 / jnp.sqrt(fan_in)
        w = jax.random.uniform(kw, (fan_in, fan_out), jnp.float32, -bound, bound)
        b = jax.random.uniform(kb, (1, fan_out), jnp.float32, -bound, bound)
        return w, b

    w1, b1 = lin(ks[0], ks[1], obs, hidden)
    w2, b2 = lin(ks[2], ks[3], hidden, hidden)
    wv, bv = lin(ks[4], ks[5], hidden, 1)
    wa, ba = lin(ks[6], ks[7], hidden, ac)
    return (w1, b1, w2, b2, wv, bv, wa, ba)


def reference_forward(x, params):
    (w1, b1, w2, b2, wv, bv, wa, ba) = params
    h = jnp.maximum(x @ w1 + b1, 0.0)
    h = jnp.maximum(h @ w2 + b2, 0.0)
    v = h @ wv + bv
    a = h @ wa + ba
    return v + a - a.mean(axis=1, keepdims=True)


if __name__ == "__main__":
    key = jax.random.PRNGKey(0)
    k_x, k_p, k_x2 = jax.random.split(key, 3)

    batch, obs, ac = 4, 32, 8
    x = jax.random.normal(k_x, (batch, obs), dtype=jnp.float32)
    params = init_params(k_p, obs, ac)

    # f32 path, tiny batch (single block)
    q = jax.block_until_ready(dueling_forward(x, params))
    q_ref = reference_forward(x, params)
    assert q.shape == (batch, ac)
    assert jnp.allclose(q, q_ref, atol=1e-5, rtol=1e-5)

    # multi-block grid path with a partial tail block, f32
    b2 = 272
    x2 = jax.random.normal(k_x2, (b2, obs), dtype=jnp.float32)
    q2 = jax.block_until_ready(dueling_forward(x2, params, block_b=128))
    q2_ref = reference_forward(x2, params)
    assert q2.shape == (b2, ac)
    assert jnp.allclose(q2, q2_ref, atol=1e-4, rtol=1e-4)

    # bf16 matmul-operand path (v6e/v7x fast path), f32 accumulate + epilogue
    q_bf = jax.block_until_ready(
        dueling_forward(x2, params, block_b=128, param_dtype=jnp.bfloat16))
    assert q_bf.shape == (b2, ac)
    assert bool(jnp.all(jnp.isfinite(q_bf)))
    assert jnp.allclose(q_bf, q2_ref, atol=1e-1, rtol=1e-1)

    print("KERNEL_OK")
</pallas_src>

<mosaic_0001>
module attributes {stable_mosaic.version = 11 : i64} {
  func.func @dueling_kernel(%arg0: i32, %arg1: memref<8x32xf32, #tpu.memory_space<vmem>>, %arg2: memref<32x128xf32, #tpu.memory_space<vmem>>, %arg3: memref<1x128xf32, #tpu.memory_space<vmem>>, %arg4: memref<128x128xf32, #tpu.memory_space<vmem>>, %arg5: memref<1x128xf32, #tpu.memory_space<vmem>>, %arg6: memref<128x128xf32, #tpu.memory_space<vmem>>, %arg7: memref<1x128xf32, #tpu.memory_space<vmem>>, %arg8: memref<8x128xf32, #tpu.memory_space<vmem>>) attributes {dimension_semantics = [#tpu.dimension_semantics<parallel>], iteration_bounds = array<i64: 1>, scalar_prefetch = 0 : i64, scratch_operands = 0 : i64, tpu.core_type = #tpu.core_type<tc>, window_params = [{transform_indices = @transform_0, window_bounds = array<i64: 8, 32>}, {pipeline_mode = #tpu.pipeline_mode<synchronous>, transform_indices = @transform_1, window_bounds = array<i64: 32, 128>}, {pipeline_mode = #tpu.pipeline_mode<synchronous>, transform_indices = @transform_2, window_bounds = array<i64: 1, 128>}, {pipeline_mode = #tpu.pipeline_mode<synchronous>, transform_indices = @transform_3, window_bounds = array<i64: 128, 128>}, {pipeline_mode = #tpu.pipeline_mode<synchronous>, transform_indices = @transform_4, window_bounds = array<i64: 1, 128>}, {pipeline_mode = #tpu.pipeline_mode<synchronous>, transform_indices = @transform_5, window_bounds = array<i64: 128, 128>}, {pipeline_mode = #tpu.pipeline_mode<synchronous>, transform_indices = @transform_6, window_bounds = array<i64: 1, 128>}, {transform_indices = @transform_7, window_bounds = array<i64: 8, 128>}]} {
    %c0 = arith.constant 0 : index
    %c0_0 = arith.constant 0 : index
    %0 = vector.load %arg1[%c0, %c0_0] : memref<8x32xf32, #tpu.memory_space<vmem>>, vector<8x32xf32>
    %c0_1 = arith.constant 0 : index
    %c0_2 = arith.constant 0 : index
    %1 = vector.load %arg2[%c0_1, %c0_2] : memref<32x128xf32, #tpu.memory_space<vmem>>, vector<32x128xf32>
    %cst = arith.constant dense<0.000000e+00> : vector<8x128xf32>
    %2 = tpu.matmul %0, %1, %cst {dimension_numbers = #tpu.dot_dimension_numbers<[1], [0], [0], [1], [0, 0, 1, 1], [], []>} : vector<8x32xf32>, vector<32x128xf32>, vector<8x128xf32> -> vector<8x128xf32>
    %c0_3 = arith.constant 0 : index
    %c0_4 = arith.constant 0 : index
    %3 = vector.load %arg3[%c0_3, %c0_4] : memref<1x128xf32, #tpu.memory_space<vmem>>, vector<1x128xf32>
    %4 = vector.broadcast %3 : vector<1x128xf32> to vector<8x128xf32>
    %5 = arith.addf %2, %4 : vector<8x128xf32>
    %cst_5 = arith.constant 0.000000e+00 : f32
    %6 = vector.broadcast %cst_5 : f32 to vector<8x128xf32>
    %7 = arith.maximumf %5, %6 : vector<8x128xf32>
    %c0_6 = arith.constant 0 : index
    %c0_7 = arith.constant 0 : index
    %8 = vector.load %arg4[%c0_6, %c0_7] : memref<128x128xf32, #tpu.memory_space<vmem>>, vector<128x128xf32>
    %cst_8 = arith.constant dense<0.000000e+00> : vector<8x128xf32>
    %9 = tpu.matmul %7, %8, %cst_8 {dimension_numbers = #tpu.dot_dimension_numbers<[1], [0], [0], [1], [0, 0, 1, 1], [], []>} : vector<8x128xf32>, vector<128x128xf32>, vector<8x128xf32> -> vector<8x128xf32>
    %c0_9 = arith.constant 0 : index
    %c0_10 = arith.constant 0 : index
    %10 = vector.load %arg5[%c0_9, %c0_10] : memref<1x128xf32, #tpu.memory_space<vmem>>, vector<1x128xf32>
    %11 = vector.broadcast %10 : vector<1x128xf32> to vector<8x128xf32>
    %12 = arith.addf %9, %11 : vector<8x128xf32>
    %cst_11 = arith.constant 0.000000e+00 : f32
    %13 = vector.broadcast %cst_11 : f32 to vector<8x128xf32>
    %14 = arith.maximumf %12, %13 : vector<8x128xf32>
    %c0_12 = arith.constant 0 : index
    %c0_13 = arith.constant 0 : index
    %15 = vector.load %arg6[%c0_12, %c0_13] : memref<128x128xf32, #tpu.memory_space<vmem>>, vector<128x128xf32>
    %cst_14 = arith.constant dense<0.000000e+00> : vector<8x128xf32>
    %16 = tpu.matmul %14, %15, %cst_14 {dimension_numbers = #tpu.dot_dimension_numbers<[1], [0], [0], [1], [0, 0, 1, 1], [], []>} : vector<8x128xf32>, vector<128x128xf32>, vector<8x128xf32> -> vector<8x128xf32>
    %c0_15 = arith.constant 0 : index
    %c0_16 = arith.constant 0 : index
    %17 = vector.load %arg7[%c0_15, %c0_16] : memref<1x128xf32, #tpu.memory_space<vmem>>, vector<1x128xf32>
    %18 = vector.broadcast %17 : vector<1x128xf32> to vector<8x128xf32>
    %19 = arith.addf %16, %18 : vector<8x128xf32>
    %20 = tpu.iota {dimensions = array<i32: 1>} : vector<8x128xi32>
    %c8_i32 = arith.constant 8 : i32
    %21 = vector.broadcast %c8_i32 : i32 to vector<8x128xi32>
    %22 = arith.cmpi slt, %20, %21 : vector<8x128xi32>
    %cst_17 = arith.constant 0.000000e+00 : f32
    %23 = vector.broadcast %cst_17 : f32 to vector<8x128xf32>
    %24 = arith.select %22, %19, %23 : vector<8x128xi1>, vector<8x128xf32>
    %cst_18 = arith.constant dense<0.000000e+00> : vector<8xf32>
    %25 = vector.multi_reduction <add>, %24, %cst_18 [1] : vector<8x128xf32> to vector<8xf32>
    %26 = vector.shape_cast %25 : vector<8xf32> to vector<8x1xf32>
    %cst_19 = arith.constant 1.250000e-01 : f32
    %27 = vector.broadcast %cst_19 : f32 to vector<8x1xf32>
    %28 = arith.mulf %26, %27 : vector<8x1xf32>
    %c8_i32_20 = arith.constant 8 : i32
    %29 = vector.broadcast %c8_i32_20 : i32 to vector<8x128xi32>
    %30 = arith.cmpi eq, %20, %29 : vector<8x128xi32>
    %cst_21 = arith.constant 0.000000e+00 : f32
    %31 = vector.broadcast %cst_21 : f32 to vector<8x128xf32>
    %32 = arith.select %30, %19, %31 : vector<8x128xi1>, vector<8x128xf32>
    %cst_22 = arith.constant dense<0.000000e+00> : vector<8xf32>
    %33 = vector.multi_reduction <add>, %32, %cst_22 [1] : vector<8x128xf32> to vector<8xf32>
    %34 = vector.shape_cast %33 : vector<8xf32> to vector<8x1xf32>
    %35 = vector.broadcast %34 : vector<8x1xf32> to vector<8x128xf32>
    %36 = arith.addf %35, %19 : vector<8x128xf32>
    %37 = vector.broadcast %28 : vector<8x1xf32> to vector<8x128xf32>
    %38 = arith.subf %36, %37 : vector<8x128xf32>
    %c0_23 = arith.constant 0 : index
    %c0_24 = arith.constant 0 : index
    %39 = vector.load %arg8[%c0_23, %c0_24] : memref<8x128xf32, #tpu.memory_space<vmem>>, vector<8x128xf32>
    tpu.vector_store %arg8[%c0_23, %c0_24], %38 {strides = array<i32>} : memref<8x128xf32, #tpu.memory_space<vmem>>, vector<8x128xf32>,
    return
  }
  func.func @transform_0(%arg0: i32) -> (i32, i32) {
    %c0_i32 = arith.constant 0 : i32
    %c0_i32_0 = arith.constant 0 : i32
    return %arg0, %c0_i32 : i32, i32
  }
  func.func @transform_1(%arg0: i32) -> (i32, i32) {
    %c0_i32 = arith.constant 0 : i32
    %c0_i32_0 = arith.constant 0 : i32
    %c0_i32_1 = arith.constant 0 : i32
    return %c0_i32, %c0_i32_0 : i32, i32
  }
  func.func @transform_2(%arg0: i32) -> (i32, i32) {
    %c0_i32 = arith.constant 0 : i32
    %c0_i32_0 = arith.constant 0 : i32
    %c0_i32_1 = arith.constant 0 : i32
    return %c0_i32, %c0_i32_0 : i32, i32
  }
  func.func @transform_3(%arg0: i32) -> (i32, i32) {
    %c0_i32 = arith.constant 0 : i32
    %c0_i32_0 = arith.constant 0 : i32
    %c0_i32_1 = arith.constant 0 : i32
    return %c0_i32, %c0_i32_0 : i32, i32
  }
  func.func @transform_4(%arg0: i32) -> (i32, i32) {
    %c0_i32 = arith.constant 0 : i32
    %c0_i32_0 = arith.constant 0 : i32
    %c0_i32_1 = arith.constant 0 : i32
    return %c0_i32, %c0_i32_0 : i32, i32
  }
  func.func @transform_5(%arg0: i32) -> (i32, i32) {
    %c0_i32 = arith.constant 0 : i32
    %c0_i32_0 = arith.constant 0 : i32
    %c0_i32_1 = arith.constant 0 : i32
    return %c0_i32, %c0_i32_0 : i32, i32
  }
  func.func @transform_6(%arg0: i32) -> (i32, i32) {
    %c0_i32 = arith.constant 0 : i32
    %c0_i32_0 = arith.constant 0 : i32
    %c0_i32_1 = arith.constant 0 : i32
    return %c0_i32, %c0_i32_0 : i32, i32
  }
  func.func @transform_7(%arg0: i32) -> (i32, i32) {
    %c0_i32 = arith.constant 0 : i32
    %c0_i32_0 = arith.constant 0 : i32
    return %arg0, %c0_i32 : i32, i32
  }
}

</mosaic_0001>

<bundles_post_ra>
// kernel: tpu_custom_call.1
= control target key start
LH: loop header
LB: loop body
LE: loop exit
PB: predicated region body
PF: predicated region fallthrough
CT: control target
= control target key end

     0   :  { %12 = vsyncpa [#allocation3], 0  ;;  %s840_s0 = inlined_call_operand.hbm [shape: f32[8,32], index: 0, kind: input, shape index: {}]   ;;  %s841_s1 = inlined_call_operand.hbm [shape: f32[32,128], index: 1, kind: input, shape index: {}]   ;;  %s842_s2 = inlined_call_operand.vmem [shape: f32[1,128], index: 2, kind: input, shape index: {}]   ;;  %s843_s3 = inlined_call_operand.hbm [shape: f32[128,128], index: 3, kind: input, shape index: {}]   ;;  %s844_s4 = inlined_call_operand.vmem [shape: f32[1,128], index: 4, kind: input, shape index: {}]   ;;  %s845_s5 = inlined_call_operand.hbm [shape: f32[128,128], index: 5, kind: input, shape index: {}]   ;;  %s846_s6 = inlined_call_operand.vmem [shape: f32[1,128], index: 6, kind: input, shape index: {}]   ;;  %s847_s7 = inlined_call_operand.hbm [shape: f32[8,128], index: 7, kind: output, shape index: {}]  }
   0x1   :  { %13 = vsyncpa [#allocation6], 0 }
   0x2   :  { %14 = vsyncpa [#allocation9], 0 }
   0x3   :  { %15 = vsyncpa [#allocation4], 0  ;;  %s691_s24 = smov [#allocation5]   ;;  %s573_s28 = scalar_lea.hbm %s841_s1, 512 }
   0x4   :  { %s31_s25 = sshll.u32 %s691_s24, 4  ;;  %p574_p0 = scmp.ne.s32.totalorder %s841_s1, %s573_s28  ;;  %s32_s25 = int_to_ptr.vmem [resolvable:$true] %s31_s25 }
   0x5   :  { %p577_p1 = scmp.lt.u32.totalorder %s573_s28, %s841_s1 }
   0x7   :  { %p579_p2 = pnand %p577_p1, %p574_p0 }
   0x9   :  { %582 = shalt.err (!%p579_p2)
}
   0xa   :  { %s583_s10 = scalar_lea.vmem %s32_s25, 512  ;;  %p588_p4 = scmp.lt.s32.totalorder %s32_s25, %s32_s25 }
   0xb   :  { %p584_p3 = scmp.ne.s32.totalorder %s32_s25, %s583_s10  ;;  %p589_p5 = scmp.lt.s32.totalorder %s583_s10, %s583_s10 }
   0xd   :  { %p590_p6 = por %p589_p5, %p588_p4 }
   0xf   :  { %p591_p7 = pnand %p590_p6, %p584_p3 }
  0x11   :  { %594 = shalt.err (!%p591_p7)
}
  0x12   :  { %s692_s11 = smov 128   ;;  %s693_s12 = smov 8  }
  0x13   :  { %37 = dma.hbm_to_vmem [thread:$0]  %s841_s1, 512, %s32_s25, [#allocation6], %s692_s11, %s692_s11, %s693_s12  }
  0x14   :  { %s694_s15 = smov [#allocation2]   ;;  %s695_s17 = smov [#allocation7]  }
  0x15   :  { %s22_s16 = sshll.u32 %s694_s15, 4  ;;  %s45_s18 = sshll.u32 %s695_s17, 4  ;;  %s23_s16 = int_to_ptr.vmem [resolvable:$true] %s22_s16  ;;  %s46_s18 = int_to_ptr.vmem [resolvable:$true] %s45_s18 }
  0x16   :  { %s595_s21 = scalar_lea.hbm %s840_s0, 128 }
  0x17   :  { %p596_p8 = scmp.ne.s32.totalorder %s840_s0, %s595_s21  ;;  %p599_p9 = scmp.lt.u32.totalorder %s595_s21, %s840_s0 }
  0x19   :  { %p601_p10 = pnand %p599_p9, %p596_p8 }
  0x1b   :  { %604 = shalt.err (!%p601_p10)
}
  0x1c   :  { %s605_s1 = scalar_lea.vmem %s23_s16, 128  ;;  %p610_p12 = scmp.lt.s32.totalorder %s23_s16, %s23_s16 }
  0x1d   :  { %p606_p11 = scmp.ne.s32.totalorder %s23_s16, %s605_s1  ;;  %p611_p13 = scmp.lt.s32.totalorder %s605_s1, %s605_s1 }
  0x1f   :  { %p612_p0 = por %p611_p13, %p610_p12 }
  0x21   :  { %p613_p1 = pnand %p612_p0, %p606_p11 }
  0x23   :  { %616 = shalt.err (!%p613_p1)
}
  0x24   :  { %25 = dma.hbm_to_vmem [thread:$0]  %s840_s0, 128, %s23_s16, [#allocation3]  }
  0x25   :  { %s617_s30 = scalar_lea.hbm %s843_s3, 2048 }
  0x26   :  { %p618_p2 = scmp.ne.s32.totalorder %s843_s3, %s617_s30  ;;  %p621_p3 = scmp.lt.u32.totalorder %s617_s30, %s843_s3 }
  0x28   :  { %p623_p4 = pnand %p621_p3, %p618_p2 }
  0x2a   :  { %626 = shalt.err (!%p623_p4)
}
  0x2b   :  { %s627_s14 = scalar_lea.vmem %s46_s18, 2048  ;;  %p632_p6 = scmp.lt.s32.totalorder %s46_s18, %s46_s18 }
  0x2c   :  { %p628_p5 = scmp.ne.s32.totalorder %s46_s18, %s627_s14  ;;  %p633_p7 = scmp.lt.s32.totalorder %s627_s14, %s627_s14 }
  0x2e   :  { %p634_p8 = por %p633_p7, %p632_p6 }
  0x30   :  { %p635_p9 = pnand %p634_p8, %p628_p5 }
  0x32   :  { %638 = shalt.err (!%p635_p9)
}
  0x33   :  { %51 = dma.hbm_to_vmem [thread:$0]  %s843_s3, 2048, %s46_s18, [#allocation6], %s692_s11, %s692_s11, %s693_s12  }
  0x34   :  { %s696_s16 = smov [#allocation8]   ;;  %s639_s21 = scalar_lea.hbm %s845_s5, 2048 }
  0x35   :  { %s59_s17 = sshll.u32 %s696_s16, 4  ;;  %p640_p10 = scmp.ne.s32.totalorder %s845_s5, %s639_s21  ;;  %s60_s17 = int_to_ptr.vmem [resolvable:$true] %s59_s17 }
  0x36   :  { %p643_p11 = scmp.lt.u32.totalorder %s639_s21, %s845_s5 }
  0x38   :  { %p645_p12 = pnand %p643_p11, %p640_p10 }
  0x3a   :  { %648 = shalt.err (!%p645_p12)
}
  0x3b   :  { %s649_s1 = scalar_lea.vmem %s60_s17, 2048  ;;  %p654_p0 = scmp.lt.s32.totalorder %s60_s17, %s60_s17 }
  0x3c   :  { %p650_p13 = scmp.ne.s32.totalorder %s60_s17, %s649_s1  ;;  %p655_p1 = scmp.lt.s32.totalorder %s649_s1, %s649_s1 }
  0x3e   :  { %p656_p2 = por %p655_p1, %p654_p0 }
  0x40   :  { %p657_p3 = pnand %p656_p2, %p650_p13 }
  0x42   :  { %660 = shalt.err (!%p657_p3)
}
  0x43   :  { %65 = dma.hbm_to_vmem [thread:$0]  %s845_s5, 2048, %s60_s17, [#allocation9], %s692_s11, %s692_s11, %s693_s12  }
  0x44   :  { %683 = dma.done.wait [#allocation3], 128  }
  0x45   :  { %684 = vsyncadd [#allocation3], 4294967168 }
  0x46   :  { %685 = dma.done.wait [#allocation6], 2560  }
  0x47   :  { %686 = vsyncadd [#allocation6], 4294964736 }
  0x48   :  { %687 = dma.done.wait [#allocation9], 2048  }
  0x49   :  { %688 = vsyncadd [#allocation9], 4294965248  ;;  %v697_v0 = vmov 0.0|0.0   ;;  %vm698_vm0 = vmmov 0   ;;  %v699_v1 = vmov 0.0   ;;  %v81_v2 = vld [vmem:[#allocation5] sm:$0xff] }
  0x4a   :  { %509 = vmatprep.subr.bf16.mxu0 %v697_v0  ;;  %436 = vmatprep.mubr.msk.f32.mxu0 %vm698_vm0, %v699_v1  ;;  %v82_v3 = vld [vmem:[#allocation5 + $0x8] sm:$0xff]  ;;  %v83_v4 = vld [vmem:[#allocation5 + $0x10] sm:$0xff]  ;;  %v84_v6 = vld [vmem:[#allocation5 + $0x18] sm:$0xff]  ;;  %vm92_vm1 = vcmask 261120  }
  0x4b   :  { %515 = vmatprep.subr.bf16.mxu1 %v697_v0  ;;  %471 = vmatprep.mubr.msk.f32.mxu1 %vm698_vm0, %v699_v1  ;;  %v510_v5 = vpack.c.bf16 %v82_v3, %v81_v2  ;;  %v167_v7 = vld [vmem:[#allocation7] sm:$0xff]  ;;  %v168_v8 = vld [vmem:[#allocation7 + $0x8] sm:$0xff]  ;;  %v169_v9 = vld [vmem:[#allocation7 + $0x10] sm:$0xff]  ;;  %v513_v11 = vpack.c.bf16 %v84_v6, %v83_v4  ;;  %v354_v3 = vlaneseq }
  0x4c   :  { %v170_v10 = vld [vmem:[#allocation7 + $0x18] sm:$0xff]  ;;  %v516_v12 = vpack.c.bf16 %v168_v8, %v167_v7  ;;  %v171_v14 = vld [vmem:[#allocation7 + $0x20] sm:$0xff]  ;;  %v172_v15 = vld [vmem:[#allocation7 + $0x28] sm:$0xff] }
  0x4d   :  { %511 = vmatpush3.bf16.msra.mxu0 %v510_v5  ;;  %v519_v13 = vpack.c.bf16 %v170_v10, %v169_v9  ;;  %v80_v16 = vld [vmem:[#allocation2] sm:$0xff]  ;;  %v522_v17 = vpack.c.bf16 %v172_v15, %v171_v14  ;;  %v173_v18 = vld [vmem:[#allocation7 + $0x30] sm:$0xff]  ;;  %v175_v21 = vld [vmem:[#allocation7 + $0x40] sm:$0xff]  ;;  %v355_v4 = vand.u32 127, %v354_v3 }
  0x4e   :  { %512 = vmatprep.subr.bf16.mxu0 %v697_v0  ;;  %517 = vmatpush3.bf16.msra.mxu1 %v516_v12  ;;  %v174_v19 = vld [vmem:[#allocation7 + $0x38] sm:$0xff]  ;;  %v176_v22 = vld [vmem:[#allocation7 + $0x48] sm:$0xff]  ;;  %v177_v24 = vld [vmem:[#allocation7 + $0x50] sm:$0xff] }
  0x4f   :  { %518 = vmatprep.subr.bf16.mxu1 %v697_v0  ;;  %v525_v20 = vpack.c.bf16 %v174_v19, %v173_v18  ;;  %v528_v23 = vpack.c.bf16 %v176_v22, %v175_v21  ;;  %v178_v25 = vld [vmem:[#allocation7 + $0x58] sm:$0xff]  ;;  %v179_v27 = vld [vmem:[#allocation7 + $0x60] sm:$0xff]  ;;  %v180_v28 = vld [vmem:[#allocation7 + $0x68] sm:$0xff]  ;;  %vm356_vm2 = vcmp.lt.s32.totalorder %v355_v4, 8  ;;  %vm361_vm3 = vcmp.eq.s32.totalorder %v355_v4, 8 }
  0x50   :  { %v531_v26 = vpack.c.bf16 %v178_v25, %v177_v24  ;;  %v534_v29 = vpack.c.bf16 %v180_v28, %v179_v27  ;;  %v181_v30 = vld [vmem:[#allocation7 + $0x70] sm:$0xff]  ;;  %v182_v31 = vld [vmem:[#allocation7 + $0x78] sm:$0xff]  ;;  %v261_v33 = vld [vmem:[#allocation8] sm:$0xff] }
  0x51   :  { %514 = vmatpush3.bf16.msra.mxu0 %v513_v11  ;;  %v537_v32 = vpack.c.bf16 %v182_v31, %v181_v30  ;;  %v262_v34 = vld [vmem:[#allocation8 + $0x8] sm:$0xff]  ;;  %v263_v35 = vld [vmem:[#allocation8 + $0x10] sm:$0xff]  ;;  %v264_v37 = vld [vmem:[#allocation8 + $0x18] sm:$0xff] }
  0x52   :  { %539 = vmatprep.subr.bf16.mxu0 %v697_v0  ;;  %520 = vmatpush3.bf16.msra.mxu1 %v519_v13  ;;  %v540_v36 = vpack.c.bf16 %v262_v34, %v261_v33  ;;  %v543_v38 = vpack.c.bf16 %v264_v37, %v263_v35  ;;  %v265_v39 = vld [vmem:[#allocation8 + $0x20] sm:$0xff]  ;;  %v266_v40 = vld [vmem:[#allocation8 + $0x28] sm:$0xff]  ;;  %v267_v42 = vld [vmem:[#allocation8 + $0x30] sm:$0xff] }
  0x53   :  { %521 = vmatprep.subr.bf16.mxu1 %v697_v0  ;;  %v546_v41 = vpack.c.bf16 %v266_v40, %v265_v39  ;;  %v268_v43 = vld [vmem:[#allocation8 + $0x38] sm:$0xff]  ;;  %v269_v45 = vld [vmem:[#allocation8 + $0x40] sm:$0xff]  ;;  %v270_v46 = vld [vmem:[#allocation8 + $0x48] sm:$0xff] }
  0x54   :  { %437 = vmatmul.mubr.msk.f32.vlgmr.msra.gmra.mrb[0].mxu0 %vm92_vm1, %v80_v16  ;;  %v549_v44 = vpack.c.bf16 %v268_v43, %v267_v42  ;;  %v552_v47 = vpack.c.bf16 %v270_v46, %v269_v45  ;;  %v271_v48 = vld [vmem:[#allocation8 + $0x50] sm:$0xff]  ;;  %v272_v49 = vld [vmem:[#allocation8 + $0x58] sm:$0xff]  ;;  %v273_v51 = vld [vmem:[#allocation8 + $0x60] sm:$0xff] }
  0x55   :  { %506 = vmatprep.mubr.msk.f32.mxu0 %vm698_vm0, %v699_v1  ;;  %541 = vmatpush3.bf16.msra.mxu0 %v540_v36  ;;  %v555_v50 = vpack.c.bf16 %v272_v49, %v271_v48  ;;  %v274_v52 = vld [vmem:[#allocation8 + $0x68] sm:$0xff]  ;;  %v385_v54 = vld [vmem:[%s842_s2] ss:$0 sm:$0xff]  ;;  %v275_v59 = vld [vmem:[#allocation8 + $0x70] sm:$0xff] }
  0x56   :  { %523 = vmatpush3.bf16.msra.mxu1 %v522_v17  ;;  %542 = vmatprep.subr.bf16.mxu0 %v697_v0  ;;  %v558_v53 = vpack.c.bf16 %v274_v52, %v273_v51  ;;  %v276_v60 = vld [vmem:[#allocation8 + $0x78] sm:$0xff] }
  0x57   :  { %524 = vmatprep.subr.bf16.mxu1 %v697_v0  ;;  %v561_v61 = vpack.c.bf16 %v276_v60, %v275_v59  ;;  %v387_v62 = vld [vmem:[%s844_s4] ss:$0 sm:$0xff]  ;;  %s700_s4 = smov [#allocation10]  }
  0x58   :  { %v388_v5 = vld [vmem:[%s846_s6] ss:$0 sm:$0xff]  ;;  %s374_s28 = sshll.u32 %s700_s4, 4  ;;  %s375_s28 = int_to_ptr.vmem [resolvable:$true] %s374_s28 }
  0x59   :  { %544 = vmatpush3.bf16.msra.mxu0 %v543_v38  ;;  %s661_s29 = scalar_lea.vmem %s375_s28, 128  ;;  %p666_p5 = scmp.lt.s32.totalorder %s375_s28, %s375_s28 }
  0x5a   :  { %526 = vmatpush3.bf16.msra.mxu1 %v525_v20  ;;  %545 = vmatprep.subr.bf16.mxu0 %v697_v0  ;;  %p662_p4 = scmp.ne.s32.totalorder %s375_s28, %s661_s29  ;;  %p667_p6 = scmp.lt.s32.totalorder %s661_s29, %s661_s29 }
  0x5b   :  { %527 = vmatprep.subr.bf16.mxu1 %v697_v0 }
  0x5c   :  { %p668_p7 = por %p667_p6, %p666_p5 }
  0x5d   :  { %547 = vmatpush3.bf16.msra.mxu0 %v546_v41 }
  0x5e   :  { %529 = vmatpush3.bf16.msra.mxu1 %v528_v23  ;;  %548 = vmatprep.subr.bf16.mxu0 %v697_v0  ;;  %p669_p8 = pnand %p668_p7, %p662_p4 }
  0x5f   :  { %530 = vmatprep.subr.bf16.mxu1 %v697_v0 }
  0x61   :  { %550 = vmatpush3.bf16.msra.mxu0 %v549_v44 }
  0x62   :  { %532 = vmatpush3.bf16.msra.mxu1 %v531_v26  ;;  %551 = vmatprep.subr.bf16.mxu0 %v697_v0 }
  0x63   :  { %533 = vmatprep.subr.bf16.mxu1 %v697_v0 }
  0x65   :  { %553 = vmatpush3.bf16.msra.mxu0 %v552_v47 }
  0x66   :  { %535 = vmatpush3.bf16.msra.mxu1 %v534_v29  ;;  %554 = vmatprep.subr.bf16.mxu0 %v697_v0 }
  0x67   :  { %536 = vmatprep.subr.bf16.mxu1 %v697_v0 }
  0x69   :  { %556 = vmatpush3.bf16.msra.mxu0 %v555_v50 }
  0x6a   :  { %538 = vmatpush3.bf16.msra.mxu1 %v537_v32  ;;  %557 = vmatprep.subr.bf16.mxu0 %v697_v0 }
  0x6d   :  { %559 = vmatpush3.bf16.msra.mxu0 %v558_v53 }
  0x6e   :  { %560 = vmatprep.subr.bf16.mxu0 %v697_v0 }
  0x71   :  { %562 = vmatpush3.bf16.msra.mxu0 %v561_v61 }
 0x127   :  { %v162_v55 = vpop.f32.mrb[0].mxu0 }
 0x128   :  { %v163_v56 = vadd.f32 %v385_v54, %v162_v55  ;;  %v438_v57 = vpop.f32.mrb[1].mxu0 }
 0x12a   :  { %v166_v58 = vmax.f32 %v163_v56, 0.0 }
 0x12c   :  { %472 = vmatmul.mubr.f32.vlgmr.msra.gmra.mrb[0].mxu1 %v166_v58 }
 0x1ff   :  { %v256_v63 = vpop.f32.mrb[0].mxu1 }
 0x200   :  { %v257_v1 = vadd.f32 %v387_v62, %v256_v63  ;;  %v473_v0 = vpop.f32.mrb[1].mxu1 }
 0x202   :  { %v260_v2 = vmax.f32 %v257_v1, 0.0 }
 0x204   :  { %507 = vmatmul.mubr.f32.vlgmr.msra.gmra.mrb[2].mxu0 %v260_v2 }
 0x2d7   :  { %v350_v6 = vpop.f32.mrb[2].mxu0 }
 0x2d8   :  { %v351_v7 = vadd.f32 %v388_v5, %v350_v6  ;;  %v508_v8 = vpop.f32.mrb[3].mxu0 }
 0x2da   :  { %v357_v9 = vsel %vm356_vm2, %v351_v7, 0.0  ;;  %v362_v10 = vsel %vm361_vm3, %v351_v7, 0.0 }
 0x2db   :  { %358 = vadd.xlane.f32.xlu0 %v357_v9 }
 0x2df   :  { %363 = vadd.xlane.f32.xlu0 %v362_v10 }
 0x368   :  { %v359_v11 = vpop.xlane.xlu0 %358 }
 0x369   :  { %v360_v13 = vmul.f32 0.125, %v359_v11 }
 0x36c   :  { %v364_v12 = vpop.xlane.xlu0 %363 }
 0x36d   :  { %v365_v14 = vadd.f32 %v364_v12, %v351_v7 }
 0x36f   :  { %v366_v15 = vsub.f32 %v365_v14, %v360_v13 }
 0x371   :  { %367 = vst [vmem:[#allocation10] sm:$0xff] %v366_v15 }
 0x372   :  { %672 = shalt.err (!%p669_p8)
}
 0x373   :  { %s673_s8 = scalar_lea.hbm %s847_s7, 128 }
 0x374   :  { %p674_p9 = scmp.ne.s32.totalorder %s847_s7, %s673_s8  ;;  %p677_p10 = scmp.lt.u32.totalorder %s673_s8, %s847_s7 }
 0x376   :  { %p679_p11 = pnand %p677_p10, %p674_p9 }
 0x378   :  { %682 = shalt.err (!%p679_p11)
}
 0x379   :  { %377 = dma.vmem_to_hbm [thread:$0]  %s375_s28, 128, %s847_s7, [#allocation4]  }
 0x37a   :  { %689 = dma.done.wait [#allocation4], 128  }
 0x37b   :  { %690 = vsyncadd [#allocation4], 4294967168 }
 0x37c   :  { %381 = vsyncpa [#allocation3], 1 }
 0x37d   :  { %382 = vsyncpa [#allocation6], 1 }
 0x37e   :  { %383 = vsyncpa [#allocation9], 1 }
 0x37f   :  { %384 = vsyncpa [#allocation4], 1 }

</bundles_post_ra>
